<compile_context>
chip_gen: v7x
topology: tpu7x:2x2x1
jax: 0.10.0
libtpu: 0.0.40
codegen_flags: <defaults>
</compile_context>

<pallas_src>
import functools
import math

import numpy as np
import jax
import jax.numpy as jnp
from jax.experimental import pallas as pl
from jax.experimental.pallas import tpu as pltpu

KERNEL_MUL = 4
KERNEL_NUM = 4
# fix_sigma=True in the PyTorch code -> bandwidth starts at bool(True) == 1.0
_BASE_BANDWIDTH = 1.0 / (KERNEL_MUL ** (KERNEL_NUM // 2))                 # 1/16
_MAX_BANDWIDTH = _BASE_BANDWIDTH * (KERNEL_MUL ** (KERNEL_NUM - 1))       # 4.0
_EPS = 1e-5


def _round_up(x, m):
    return ((x + m - 1) // m) * m


def _vmem_estimate(tile_m, d, itemsize):
    slabs = 2 * 2 * tile_m * d * itemsize          # 2 slabs x double-buffered
    temps = 12 * tile_m * tile_m * 4               # gram/d2/exp chain/kmat/masks
    small = 8 * tile_m * 4                         # norm blocks, acc, out
    return slabs + temps + small


def _choose_tile_m(m, d, tile_m_max, itemsize, budget=24 << 20):
    """Pick tile_m: full-M single tile when small, else a multiple of 128."""
    m8 = _round_up(m, 8)
    cap = max(8, int(tile_m_max))
    if m8 <= cap and _vmem_estimate(m8, d, itemsize) <= budget:
        return m8                                  # single tile along rows/cols
    # Multi-tile: tile_m must be a multiple of 128 so the (1, tile_m) norm
    # blocks satisfy the lane-tiling constraint; shrink for the VMEM budget
    # (use tile_m_max=128 on v5e; 128 also helps v7x's smaller 64 MiB VMEM).
    t = max(128, (min(cap, 512) // 128) * 128)
    while t > 128 and _vmem_estimate(t, d, itemsize) > budget:
        t -= 128
    return t


def _mmd_tile_kernel(ri_ref, ci_ref, w_ref, nm_ref,
                     xr_ref, xc_ref, rn_ref, cn_ref,
                     out_ref, acc_ref,
                     *, n_split, m_total, tile_m, steps):
    """One (tile_m, tile_m) tile of the signed Gaussian-kernel reduction.

    grid = (n_parts, steps): the leading axis splits the upper-triangular tile
    list into contiguous partitions (one per TensorCore on v7x); the trailing
    axis walks the tiles of one partition.  K is symmetric, so strictly-lower
    tiles are never computed; off-diagonal elements get weight 2, diagonal 1.
    """
    c = pl.program_id(0)
    s = pl.program_id(1)
    idx = c * steps + s

    @pl.when(s == 0)
    def _init():
        acc_ref[...] = jnp.zeros_like(acc_ref)

    # Pairwise squared L2 distances in Gram (MXU) form, NT contraction so no
    # in-kernel transpose:  d2[i,j] = ||xr_i||^2 + ||xc_j||^2 - 2 <xr_i, xc_j>.
    gram = jax.lax.dot_general(
        xr_ref[...], xc_ref[...],
        dimension_numbers=(((1,), (1,)), ((), ())),
        preferred_element_type=jnp.float32)                    # (tile_m, tile_m)
    # Norms are precomputed in the wrapper (f32); clamp absorbs f32/bf16
    # cancellation noise for the (exact-)duplicate rows build_total creates.
    d2 = jnp.maximum(rn_ref[...] + cn_ref[...] - 2.0 * gram, 0.0)

    # Multi-bandwidth Gaussian kernel sum (kernel_mul=4, kernel_num=4).
    # One EUP exp at the largest bandwidth, remaining bandwidths via VPU
    # squaring: exp(-d2/(bw/4)) == exp(-d2/bw)^4.  (The reference applies the
    # +1e-5 epsilon per bandwidth; here it enters only through the base exp —
    # ~1e-4 relative deviation on already-tiny kernel values.)
    t = jnp.exp(d2 * (-1.0 / (_MAX_BANDWIDTH + _EPS)))         # bandwidth 4
    t2 = t * t
    t4 = t2 * t2                                               # bandwidth 1
    t8 = t4 * t4
    t16 = t8 * t8                                              # bandwidth 1/4
    t32 = t16 * t16
    t64 = t32 * t32                                            # bandwidth 1/16
    kmat = t + t4 + t16 + t64

    nm = nm_ref[idx]

    @pl.when(nm == 0)
    def _fast():
        # Interior tile: constant weight (+-2 symmetric, 0 for dummy padding
        # tiles).  Sublane-partial reduce only; no iota/select mask built.
        w = w_ref[idx].astype(jnp.float32)
        acc_ref[...] += w * jnp.sum(kmat, axis=0, keepdims=True)

    @pl.when(nm != 0)
    def _masked():
        # Diagonal / split-boundary / padding tile: build the full weight mask.
        r0 = ri_ref[idx] * tile_m
        c0 = ci_ref[idx] * tile_m
        row = r0 + jax.lax.broadcasted_iota(jnp.int32, (tile_m, tile_m), 0)
        col = c0 + jax.lax.broadcasted_iota(jnp.int32, (tile_m, tile_m), 1)
        sign = jnp.where((row < n_split) == (col < n_split), 1.0, -1.0)
        sym_w = jnp.where(col > row, 2.0, jnp.where(col == row, 1.0, 0.0))
        valid = jnp.logical_and(row < m_total, col < m_total)
        weight = jnp.where(valid, sign * sym_w, 0.0)
        acc_ref[...] += jnp.sum(weight * kmat, axis=0, keepdims=True)

    @pl.when(s == pl.num_programs(1) - 1)
    def _finalize():
        out_ref[...] = jnp.sum(acc_ref[...], keepdims=True)    # (1, 1)


def mmd_pallas(total, n_split, *, tile_m_max=256, matmul_dtype=jnp.bfloat16):
    """total: (2*n_split, D) float array -> scalar float32 MMD loss."""
    total = jnp.asarray(total)
    m, d = total.shape
    n_split = int(n_split)

    itemsize = int(np.dtype(matmul_dtype).itemsize)
    tile_m = _choose_tile_m(m, d, tile_m_max, itemsize)
    m_pad = _round_up(m, tile_m)

    # bf16 operands for the MXU Gram matmul (bf16-native on v5e/v6e/v7x);
    # the norms and the d2 correction stay f32.  Norms are computed from the
    # *cast* data so the Gram form still cancels for duplicate rows.
    total_mm = total.astype(matmul_dtype)
    if m_pad != m:
        total_mm = jnp.pad(total_mm, ((0, m_pad - m), (0, 0)))
    norms = jnp.sum(jnp.square(total_mm.astype(jnp.float32)), axis=1)   # (m_pad,)
    norms_col = norms[:, None]                                          # (m_pad, 1)
    norms_row = norms[None, :]                                          # (1, m_pad)

    n_tiles = m_pad // tile_m

    # Upper-triangular tile enumeration + per-tile weight classification.
    # Tuple: (row_tile, col_tile, scalar_weight_int, needs_mask_flag).
    tiles = []
    for i in range(n_tiles):
        for j in range(i, n_tiles):
            r_lo, r_hi = i * tile_m, (i + 1) * tile_m
            c_lo, c_hi = j * tile_m, (j + 1) * tile_m
            diag = i == j
            crosses = (r_lo < n_split < r_hi) or (c_lo < n_split < c_hi)
            has_pad = (r_hi > m) or (c_hi > m)
            if diag or crosses or has_pad:
                tiles.append((i, j, 0, 1))                      # masked path
            else:
                same = (r_hi <= n_split) == (c_hi <= n_split)
                tiles.append((i, j, 2 if same else -2, 0))      # fast path

    # Two contiguous partitions along a leading "parallel" grid axis so the two
    # TensorCores of a v7x chip each own ~half of the tiles (serial & harmless
    # on single-core v5e/v6e).  Pad the shorter partition with zero-weight
    # dummy tiles (weight 0, fast path -> contributes exactly 0).
    n_parts = 2 if len(tiles) >= 2 else 1
    steps = -(-len(tiles) // n_parts)
    while len(tiles) < n_parts * steps:
        tiles.append((0, 0, 0, 0))

    row_ids = jnp.asarray(np.array([t[0] for t in tiles], np.int32))
    col_ids = jnp.asarray(np.array([t[1] for t in tiles], np.int32))
    w_scal = jnp.asarray(np.array([t[2] for t in tiles], np.int32))
    nm_flag = jnp.asarray(np.array([t[3] for t in tiles], np.int32))

    kernel = functools.partial(_mmd_tile_kernel, n_split=n_split,
                               m_total=int(m), tile_m=int(tile_m),
                               steps=int(steps))

    def idx(c, s):
        return c * steps + s

    grid_spec = pltpu.PrefetchScalarGridSpec(
        num_scalar_prefetch=4,
        grid=(n_parts, steps),
        in_specs=[
            # row slab (tile_m, D) — reused across consecutive steps of a row
            pl.BlockSpec((tile_m, d), lambda c, s, ri, ci, w, nm: (ri[idx(c, s)], 0)),
            # col slab (tile_m, D)
            pl.BlockSpec((tile_m, d), lambda c, s, ri, ci, w, nm: (ci[idx(c, s)], 0)),
            # precomputed row norms (tile_m, 1)
            pl.BlockSpec((tile_m, 1), lambda c, s, ri, ci, w, nm: (ri[idx(c, s)], 0)),
            # precomputed col norms (1, tile_m)
            pl.BlockSpec((1, tile_m), lambda c, s, ri, ci, w, nm: (0, ci[idx(c, s)])),
        ],
        out_specs=pl.BlockSpec((1, 1), lambda c, s, ri, ci, w, nm: (c, 0)),
        scratch_shapes=[pltpu.VMEM((1, tile_m), jnp.float32)],
    )

    vmem_bytes = _vmem_estimate(tile_m, d, itemsize)
    out = pl.pallas_call(
        kernel,
        out_shape=jax.ShapeDtypeStruct((n_parts, 1), jnp.float32),
        grid_spec=grid_spec,
        compiler_params=pltpu.CompilerParams(
            dimension_semantics=("parallel", "arbitrary"),
            # Explicit VMEM budget: stays well below v7x's 64 MiB physical.
            vmem_limit_bytes=int(min(max(32 << 20, 2 * vmem_bytes), 48 << 20))),
    )(row_ids, col_ids, w_scal, nm_flag, total_mm, total_mm, norms_col, norms_row)

    return jnp.sum(out) * (1.0 / float(n_split * n_split))


def build_total(embeddings, labels, default_class=1, check_zero_features=False):
    """Host-side glue reproducing MMD.forward / mmd_loss / mmd() setup.

    Returns (total, batch) or (None, None) when only one class is present
    (PyTorch returns loss == 0 in that case).
    """
    labels = np.asarray(labels)
    labels = np.where(labels != default_class, 0, labels)
    if default_class != 1:
        labels = np.where(labels == default_class, 1, labels)

    if np.unique(labels).size == 1:
        return None, None

    embeddings = jnp.asarray(embeddings)
    src = embeddings[np.flatnonzero(labels == 0)]
    tgt = embeddings[np.flatnonzero(labels == 1)]
    ns, nt = int(src.shape[0]), int(tgt.shape[0])
    batch = ns + nt

    src_rep = jnp.concatenate([src] * math.ceil(batch / ns), axis=0)[:batch]
    tgt_rep = jnp.concatenate([tgt] * math.ceil(batch / nt), axis=0)[:batch]

    if check_zero_features:
        # Off by default: this float() forces a device->host sync every call.
        if float(jnp.mean(jnp.abs(src_rep) + jnp.abs(tgt_rep))) <= 1e-7:
            print("Warning: feature representations tend towards zero. "
                  "Consider decreasing 'da_lambda' or using lambda schedule.")

    total = jnp.concatenate([src_rep, tgt_rep], axis=0)        # (2*batch, D)
    return total, batch


def mmd_forward(embeddings, labels, default_class=1, tile_m_max=256):
    total, batch = build_total(embeddings, labels, default_class)
    if total is None:
        return jnp.asarray(0.0, dtype=jnp.float32)
    return mmd_pallas(total, batch, tile_m_max=tile_m_max)


def _mmd_reference_jax(total, n_split):
    """Pure-JAX reference mirroring the PyTorch math (for validation)."""
    x = jnp.asarray(total).astype(jnp.float32)
    diff = x[None, :, :] - x[:, None, :]
    d2 = jnp.sum(diff * diff, axis=2)
    k = sum(jnp.exp(-d2 / (_BASE_BANDWIDTH * (KERNEL_MUL ** i) + _EPS))
            for i in range(KERNEL_NUM))
    n = n_split
    xx, yy = k[:n, :n], k[n:, n:]
    xy, yx = k[:n, n:], k[n:, :n]
    return jnp.mean(xx + yy - xy - yx)


if __name__ == "__main__":
    key = jax.random.PRNGKey(0)
    k1, k2, k3 = jax.random.split(key, 3)
    hidden = 32

    # Case 1: small shapes consistent with the module — (N, D) embeddings and
    # integer domain labels containing both classes.  Single tile, the
    # src/tgt sign boundary falls mid-tile.
    embeddings = jax.random.normal(k1, (16, hidden), dtype=jnp.float32)
    labels = jnp.array([0, 1, 1, 0, 0, 1, 0, 1, 1, 0, 1, 0, 0, 1, 1, 0],
                       dtype=jnp.int32)
    loss = jax.block_until_ready(mmd_forward(embeddings, labels, default_class=1))
    total, batch = build_total(embeddings, labels, default_class=1)
    ref = jax.block_until_ready(_mmd_reference_jax(total, batch))
    np.testing.assert_allclose(np.asarray(loss), np.asarray(ref),
                               rtol=2e-3, atol=3e-4)

    # Case 2: row padding inside a single tile (M = 44 -> padded to 48).
    emb2 = jax.random.normal(k2, (22, hidden), dtype=jnp.float32)
    labels2 = jnp.array([0, 1] * 11, dtype=jnp.int32)
    total2, batch2 = build_total(emb2, labels2, default_class=1)
    loss2 = jax.block_until_ready(mmd_pallas(total2, batch2))
    ref2 = jax.block_until_ready(_mmd_reference_jax(total2, batch2))
    np.testing.assert_allclose(np.asarray(loss2), np.asarray(ref2),
                               rtol=2e-3, atol=3e-4)

    # Case 3: multi-tile triangular grid (tile_m=128, M=256), scalar fast-path
    # tiles, 2-partition "parallel" axis with one dummy tile.
    emb3 = jax.random.normal(k3, (128, hidden), dtype=jnp.float32)
    labels3 = jnp.concatenate([jnp.zeros((60,), jnp.int32),
                               jnp.ones((68,), jnp.int32)])
    total3, batch3 = build_total(emb3, labels3, default_class=1)
    loss3 = jax.block_until_ready(mmd_pallas(total3, batch3, tile_m_max=128))
    ref3 = jax.block_until_ready(_mmd_reference_jax(total3, batch3))
    np.testing.assert_allclose(np.asarray(loss3), np.asarray(ref3),
                               rtol=2e-3, atol=3e-4)

    # Single-class labels -> loss 0 (matches the PyTorch early return).
    loss0 = jax.block_until_ready(
        mmd_forward(embeddings, jnp.ones((16,), jnp.int32)))
    assert float(loss0) == 0.0

    print("KERNEL_OK")
</pallas_src>

<mosaic_0001>
module attributes {stable_mosaic.version = 11 : i64} {
  func.func @_mmd_tile_kernel(%arg0: i32, %arg1: i32, %arg2: memref<1xi32, #tpu.memory_space<smem>>, %arg3: memref<1xi32, #tpu.memory_space<smem>>, %arg4: memref<1xi32, #tpu.memory_space<smem>>, %arg5: memref<1xi32, #tpu.memory_space<smem>>, %arg6: memref<32x32xbf16, #tpu.memory_space<vmem>>, %arg7: memref<32x32xbf16, #tpu.memory_space<vmem>>, %arg8: memref<32x1xf32, #tpu.memory_space<vmem>>, %arg9: memref<1x32xf32, #tpu.memory_space<vmem>>, %arg10: memref<1x1xf32, #tpu.memory_space<vmem>>, %arg11: memref<1x32xf32, #tpu.memory_space<vmem>>) attributes {dimension_semantics = [#tpu.dimension_semantics<parallel>, #tpu.dimension_semantics<arbitrary>], iteration_bounds = array<i64: 1, 1>, scalar_prefetch = 4 : i64, scratch_operands = 1 : i64, tpu.core_type = #tpu.core_type<tc>, window_params = [{transform_indices = @transform_0, window_bounds = array<i64: 32, 32>}, {transform_indices = @transform_1, window_bounds = array<i64: 32, 32>}, {transform_indices = @transform_2, window_bounds = array<i64: 32, 1>}, {transform_indices = @transform_3, window_bounds = array<i64: 1, 32>}, {transform_indices = @transform_4, window_bounds = array<i64: 1, 1>}]} {
    %c1_i32 = arith.constant 1 : i32
    %0 = arith.muli %arg0, %c1_i32 : i32
    %1 = arith.addi %0, %arg1 : i32
    %c0_i32 = arith.constant 0 : i32
    %2 = arith.cmpi eq, %arg1, %c0_i32 : i32
    %3 = arith.extui %2 : i1 to i32
    %c0_i32_0 = arith.constant 0 : i32
    %4 = arith.cmpi ne, %3, %c0_i32_0 : i32
    scf.if %4 {
      %cst_17 = arith.constant 0.000000e+00 : f32
      %41 = vector.broadcast %cst_17 : f32 to vector<1x32xf32>
      %c0_18 = arith.constant 0 : index
      %c0_19 = arith.constant 0 : index
      %42 = vector.load %arg11[%c0_18, %c0_19] : memref<1x32xf32, #tpu.memory_space<vmem>>, vector<1x32xf32>
      tpu.vector_store %arg11[%c0_18, %c0_19], %41 {strides = array<i32>} : memref<1x32xf32, #tpu.memory_space<vmem>>, vector<1x32xf32>,
    } else {
    }
    %c0 = arith.constant 0 : index
    %c0_1 = arith.constant 0 : index
    %5 = vector.load %arg6[%c0, %c0_1] : memref<32x32xbf16, #tpu.memory_space<vmem>>, vector<32x32xbf16>
    %c0_2 = arith.constant 0 : index
    %c0_3 = arith.constant 0 : index
    %6 = vector.load %arg7[%c0_2, %c0_3] : memref<32x32xbf16, #tpu.memory_space<vmem>>, vector<32x32xbf16>
    %cst = arith.constant dense<0.000000e+00> : vector<32x32xf32>
    %7 = tpu.matmul %5, %6, %cst {dimension_numbers = #tpu.dot_dimension_numbers<[1], [1], [0], [0], [0, 0, 1, 0], [], []>} : vector<32x32xbf16>, vector<32x32xbf16>, vector<32x32xf32> -> vector<32x32xf32>
    %c0_4 = arith.constant 0 : index
    %c0_5 = arith.constant 0 : index
    %8 = vector.load %arg8[%c0_4, %c0_5] : memref<32x1xf32, #tpu.memory_space<vmem>>, vector<32x1xf32>
    %c0_6 = arith.constant 0 : index
    %c0_7 = arith.constant 0 : index
    %9 = vector.load %arg9[%c0_6, %c0_7] : memref<1x32xf32, #tpu.memory_space<vmem>>, vector<1x32xf32>
    %10 = vector.broadcast %8 : vector<32x1xf32> to vector<32x32xf32>
    %11 = vector.broadcast %9 : vector<1x32xf32> to vector<32x32xf32>
    %12 = arith.addf %10, %11 : vector<32x32xf32>
    %cst_8 = arith.constant 2.000000e+00 : f32
    %13 = vector.broadcast %cst_8 : f32 to vector<32x32xf32>
    %14 = arith.mulf %13, %7 : vector<32x32xf32>
    %15 = arith.subf %12, %14 : vector<32x32xf32>
    %cst_9 = arith.constant 0.000000e+00 : f32
    %16 = vector.broadcast %cst_9 : f32 to vector<32x32xf32>
    %17 = arith.maximumf %15, %16 : vector<32x32xf32>
    %cst_10 = arith.constant -0.249999374 : f32
    %18 = vector.broadcast %cst_10 : f32 to vector<32x32xf32>
    %19 = arith.mulf %17, %18 : vector<32x32xf32>
    %20 = math.exp %19 : vector<32x32xf32>
    %21 = arith.mulf %20, %20 : vector<32x32xf32>
    %22 = arith.mulf %21, %21 : vector<32x32xf32>
    %23 = arith.mulf %22, %22 : vector<32x32xf32>
    %24 = arith.mulf %23, %23 : vector<32x32xf32>
    %25 = arith.mulf %24, %24 : vector<32x32xf32>
    %26 = arith.mulf %25, %25 : vector<32x32xf32>
    %27 = arith.addf %20, %22 : vector<32x32xf32>
    %28 = arith.addf %27, %24 : vector<32x32xf32>
    %29 = arith.addf %28, %26 : vector<32x32xf32>
    %30 = arith.index_cast %1 : i32 to index
    %31 = memref.load %arg5[%30] : memref<1xi32, #tpu.memory_space<smem>>
    %c0_i32_11 = arith.constant 0 : i32
    %32 = arith.cmpi eq, %31, %c0_i32_11 : i32
    %33 = arith.extui %32 : i1 to i32
    %c0_i32_12 = arith.constant 0 : i32
    %34 = arith.cmpi ne, %33, %c0_i32_12 : i32
    scf.if %34 {
      %41 = arith.index_cast %1 : i32 to index
      %42 = memref.load %arg4[%41] : memref<1xi32, #tpu.memory_space<smem>>
      %43 = arith.sitofp %42 : i32 to f32
      %c0_17 = arith.constant 0 : index
      %c0_18 = arith.constant 0 : index
      %44 = vector.load %arg11[%c0_17, %c0_18] : memref<1x32xf32, #tpu.memory_space<vmem>>, vector<1x32xf32>
      %cst_19 = arith.constant dense<0.000000e+00> : vector<32xf32>
      %45 = vector.multi_reduction <add>, %29, %cst_19 [0] : vector<32x32xf32> to vector<32xf32>
      %46 = vector.shape_cast %45 : vector<32xf32> to vector<1x32xf32>
      %47 = vector.broadcast %43 : f32 to vector<1x32xf32>
      %48 = arith.mulf %47, %46 : vector<1x32xf32>
      %49 = arith.addf %44, %48 : vector<1x32xf32>
      %c0_20 = arith.constant 0 : index
      %c0_21 = arith.constant 0 : index
      %50 = vector.load %arg11[%c0_20, %c0_21] : memref<1x32xf32, #tpu.memory_space<vmem>>, vector<1x32xf32>
      tpu.vector_store %arg11[%c0_20, %c0_21], %49 {strides = array<i32>} : memref<1x32xf32, #tpu.memory_space<vmem>>, vector<1x32xf32>,
    } else {
    }
    %c0_i32_13 = arith.constant 0 : i32
    %35 = arith.cmpi ne, %31, %c0_i32_13 : i32
    %36 = arith.extui %35 : i1 to i32
    %c0_i32_14 = arith.constant 0 : i32
    %37 = arith.cmpi ne, %36, %c0_i32_14 : i32
    scf.if %37 {
      %41 = arith.index_cast %1 : i32 to index
      %42 = memref.load %arg2[%41] : memref<1xi32, #tpu.memory_space<smem>>
      %c32_i32 = arith.constant 32 : i32
      %43 = arith.muli %42, %c32_i32 : i32
      %44 = arith.index_cast %1 : i32 to index
      %45 = memref.load %arg3[%44] : memref<1xi32, #tpu.memory_space<smem>>
      %c32_i32_17 = arith.constant 32 : i32
      %46 = arith.muli %45, %c32_i32_17 : i32
      %47 = tpu.iota {dimensions = array<i32: 0>} : vector<32x32xi32>
      %48 = vector.broadcast %43 : i32 to vector<32x32xi32>
      %49 = arith.addi %48, %47 : vector<32x32xi32>
      %50 = tpu.iota {dimensions = array<i32: 1>} : vector<32x32xi32>
      %51 = vector.broadcast %46 : i32 to vector<32x32xi32>
      %52 = arith.addi %51, %50 : vector<32x32xi32>
      %c16_i32 = arith.constant 16 : i32
      %53 = vector.broadcast %c16_i32 : i32 to vector<32x32xi32>
      %54 = arith.cmpi slt, %49, %53 : vector<32x32xi32>
      %c16_i32_18 = arith.constant 16 : i32
      %55 = vector.broadcast %c16_i32_18 : i32 to vector<32x32xi32>
      %56 = arith.cmpi slt, %52, %55 : vector<32x32xi32>
      %57 = arith.xori %54, %56 : vector<32x32xi1>
      %cst_19 = arith.constant dense<true> : vector<32x32xi1>
      %58 = arith.xori %57, %cst_19 : vector<32x32xi1>
      %cst_20 = arith.constant 1.000000e+00 : f32
      %cst_21 = arith.constant -1.000000e+00 : f32
      %59 = vector.broadcast %cst_20 : f32 to vector<32x32xf32>
      %60 = vector.broadcast %cst_21 : f32 to vector<32x32xf32>
      %61 = arith.select %58, %59, %60 : vector<32x32xi1>, vector<32x32xf32>
      %62 = arith.cmpi sgt, %52, %49 : vector<32x32xi32>
      %63 = arith.cmpi eq, %52, %49 : vector<32x32xi32>
      %cst_22 = arith.constant 1.000000e+00 : f32
      %cst_23 = arith.constant 0.000000e+00 : f32
      %64 = vector.broadcast %cst_22 : f32 to vector<32x32xf32>
      %65 = vector.broadcast %cst_23 : f32 to vector<32x32xf32>
      %66 = arith.select %63, %64, %65 : vector<32x32xi1>, vector<32x32xf32>
      %cst_24 = arith.constant 2.000000e+00 : f32
      %67 = vector.broadcast %cst_24 : f32 to vector<32x32xf32>
      %68 = arith.select %62, %67, %66 : vector<32x32xi1>, vector<32x32xf32>
      %c32_i32_25 = arith.constant 32 : i32
      %69 = vector.broadcast %c32_i32_25 : i32 to vector<32x32xi32>
      %70 = arith.cmpi slt, %49, %69 : vector<32x32xi32>
      %c32_i32_26 = arith.constant 32 : i32
      %71 = vector.broadcast %c32_i32_26 : i32 to vector<32x32xi32>
      %72 = arith.cmpi slt, %52, %71 : vector<32x32xi32>
      %73 = arith.andi %70, %72 : vector<32x32xi1>
      %74 = arith.mulf %61, %68 : vector<32x32xf32>
      %cst_27 = arith.constant 0.000000e+00 : f32
      %75 = vector.broadcast %cst_27 : f32 to vector<32x32xf32>
      %76 = arith.select %73, %74, %75 : vector<32x32xi1>, vector<32x32xf32>
      %c0_28 = arith.constant 0 : index
      %c0_29 = arith.constant 0 : index
      %77 = vector.load %arg11[%c0_28, %c0_29] : memref<1x32xf32, #tpu.memory_space<vmem>>, vector<1x32xf32>
      %78 = arith.mulf %76, %29 : vector<32x32xf32>
      %cst_30 = arith.constant dense<0.000000e+00> : vector<32xf32>
      %79 = vector.multi_reduction <add>, %78, %cst_30 [0] : vector<32x32xf32> to vector<32xf32>
      %80 = vector.shape_cast %79 : vector<32xf32> to vector<1x32xf32>
      %81 = arith.addf %77, %80 : vector<1x32xf32>
      %c0_31 = arith.constant 0 : index
      %c0_32 = arith.constant 0 : index
      %82 = vector.load %arg11[%c0_31, %c0_32] : memref<1x32xf32, #tpu.memory_space<vmem>>, vector<1x32xf32>
      tpu.vector_store %arg11[%c0_31, %c0_32], %81 {strides = array<i32>} : memref<1x32xf32, #tpu.memory_space<vmem>>, vector<1x32xf32>,
    } else {
    }
    %c0_i32_15 = arith.constant 0 : i32
    %38 = arith.cmpi eq, %arg1, %c0_i32_15 : i32
    %39 = arith.extui %38 : i1 to i32
    %c0_i32_16 = arith.constant 0 : i32
    %40 = arith.cmpi ne, %39, %c0_i32_16 : i32
    scf.if %40 {
      %c0_17 = arith.constant 0 : index
      %c0_18 = arith.constant 0 : index
      %41 = vector.load %arg11[%c0_17, %c0_18] : memref<1x32xf32, #tpu.memory_space<vmem>>, vector<1x32xf32>
      %42 = vector.shape_cast %41 : vector<1x32xf32> to vector<1x1x32xf32>
      %cst_19 = arith.constant dense<0.000000e+00> : vector<1xf32>
      %43 = vector.multi_reduction <add>, %42, %cst_19 [1, 2] : vector<1x1x32xf32> to vector<1xf32>
      %44 = vector.shape_cast %43 : vector<1xf32> to vector<1x1x1xf32>
      %45 = vector.extract %44[0, 0, 0] : f32 from vector<1x1x1xf32>
      %46 = vector.broadcast %45 : f32 to vector<1x1xf32>
      %c0_20 = arith.constant 0 : index
      %c0_21 = arith.constant 0 : index
      %47 = vector.load %arg10[%c0_20, %c0_21] : memref<1x1xf32, #tpu.memory_space<vmem>>, vector<1x1xf32>
      tpu.vector_store %arg10[%c0_20, %c0_21], %46 {strides = array<i32>} : memref<1x1xf32, #tpu.memory_space<vmem>>, vector<1x1xf32>,
    } else {
    }
    return
  }
  func.func @transform_0(%arg0: i32, %arg1: i32, %arg2: memref<1xi32, #tpu.memory_space<smem>>, %arg3: memref<1xi32, #tpu.memory_space<smem>>, %arg4: memref<1xi32, #tpu.memory_space<smem>>, %arg5: memref<1xi32, #tpu.memory_space<smem>>) -> (i32, i32) {
    %c1_i32 = arith.constant 1 : i32
    %0 = arith.muli %arg0, %c1_i32 : i32
    %1 = arith.addi %0, %arg1 : i32
    %2 = arith.index_cast %1 : i32 to index
    %3 = memref.load %arg2[%2] : memref<1xi32, #tpu.memory_space<smem>>
    %c0_i32 = arith.constant 0 : i32
    %c0_i32_0 = arith.constant 0 : i32
    return %3, %c0_i32 : i32, i32
  }
  func.func @transform_1(%arg0: i32, %arg1: i32, %arg2: memref<1xi32, #tpu.memory_space<smem>>, %arg3: memref<1xi32, #tpu.memory_space<smem>>, %arg4: memref<1xi32, #tpu.memory_space<smem>>, %arg5: memref<1xi32, #tpu.memory_space<smem>>) -> (i32, i32) {
    %c1_i32 = arith.constant 1 : i32
    %0 = arith.muli %arg0, %c1_i32 : i32
    %1 = arith.addi %0, %arg1 : i32
    %2 = arith.index_cast %1 : i32 to index
    %3 = memref.load %arg3[%2] : memref<1xi32, #tpu.memory_space<smem>>
    %c0_i32 = arith.constant 0 : i32
    %c0_i32_0 = arith.constant 0 : i32
    return %3, %c0_i32 : i32, i32
  }
  func.func @transform_2(%arg0: i32, %arg1: i32, %arg2: memref<1xi32, #tpu.memory_space<smem>>, %arg3: memref<1xi32, #tpu.memory_space<smem>>, %arg4: memref<1xi32, #tpu.memory_space<smem>>, %arg5: memref<1xi32, #tpu.memory_space<smem>>) -> (i32, i32) {
    %c1_i32 = arith.constant 1 : i32
    %0 = arith.muli %arg0, %c1_i32 : i32
    %1 = arith.addi %0, %arg1 : i32
    %2 = arith.index_cast %1 : i32 to index
    %3 = memref.load %arg2[%2] : memref<1xi32, #tpu.memory_space<smem>>
    %c0_i32 = arith.constant 0 : i32
    %c0_i32_0 = arith.constant 0 : i32
    return %3, %c0_i32 : i32, i32
  }
  func.func @transform_3(%arg0: i32, %arg1: i32, %arg2: memref<1xi32, #tpu.memory_space<smem>>, %arg3: memref<1xi32, #tpu.memory_space<smem>>, %arg4: memref<1xi32, #tpu.memory_space<smem>>, %arg5: memref<1xi32, #tpu.memory_space<smem>>) -> (i32, i32) {
    %c1_i32 = arith.constant 1 : i32
    %0 = arith.muli %arg0, %c1_i32 : i32
    %1 = arith.addi %0, %arg1 : i32
    %2 = arith.index_cast %1 : i32 to index
    %3 = memref.load %arg3[%2] : memref<1xi32, #tpu.memory_space<smem>>
    %c0_i32 = arith.constant 0 : i32
    %c0_i32_0 = arith.constant 0 : i32
    return %c0_i32, %3 : i32, i32
  }
  func.func @transform_4(%arg0: i32, %arg1: i32, %arg2: memref<1xi32, #tpu.memory_space<smem>>, %arg3: memref<1xi32, #tpu.memory_space<smem>>, %arg4: memref<1xi32, #tpu.memory_space<smem>>, %arg5: memref<1xi32, #tpu.memory_space<smem>>) -> (i32, i32) {
    %c0_i32 = arith.constant 0 : i32
    %c0_i32_0 = arith.constant 0 : i32
    return %arg0, %c0_i32 : i32, i32
  }
}

</mosaic_0001>

<bundles_post_ra>
// kernel: tpu_custom_call.1
= control target key start
LH: loop header
LB: loop body
LE: loop exit
PB: predicated region body
PF: predicated region fallthrough
CT: control target
= control target key end

     0   :  { %s731_s0 = inlined_call_operand.<no memory space> [shape: s32[1], index: 0, kind: input, shape index: {}]   ;;  %s732_s1 = inlined_call_operand.<no memory space> [shape: s32[1], index: 1, kind: input, shape index: {}]   ;;  %s733_s2 = inlined_call_operand.<no memory space> [shape: s32[1], index: 2, kind: input, shape index: {}]   ;;  %s734_s3 = inlined_call_operand.<no memory space> [shape: s32[1], index: 3, kind: input, shape index: {}]   ;;  %s735_s4 = inlined_call_operand.vmem [shape: bf16[32,32], index: 4, kind: input, shape index: {}]   ;;  %s736_s5 = inlined_call_operand.vmem [shape: bf16[32,32], index: 5, kind: input, shape index: {}]   ;;  %s737_s6 = inlined_call_operand.vmem [shape: f32[32,1], index: 6, kind: input, shape index: {}]   ;;  %s738_s7 = inlined_call_operand.vmem [shape: f32[1,32], index: 7, kind: input, shape index: {}]   ;;  %s739_s8 = inlined_call_operand.hbm [shape: f32[1,1], index: 8, kind: output, shape index: {}]  }
   0x1   :  { %13 = sst [smem:[#allocation4]] %s731_s0 }
   0x2   :  { %14 = sst [smem:[#allocation5]] %s732_s1 }
   0x3   :  { %15 = sst [smem:[#allocation6]] %s733_s2 }
   0x4   :  { %17 = vsyncpa [#allocation9], 0  ;;  %s628_s11 = sld [smem:[#allocation5]]  ;;  %vm740_vm0 = vcmask 253952   ;;  %v568_v0 = vmov 0.0   ;;  %v569_v1 = vmov 0  }
   0x5   :  { %133 = vst.msk [vmem:[#allocation2] sm:$0x1] %vm740_vm0, %v568_v0  ;;  %s90_s12 = sld [smem:[#allocation4]]  ;;  %531 = vset.pattern.permute.xlu1 %v569_v1  ;;  %530 = vset.pattern.permute.xlu0 %v569_v1  ;;  %vm741_vm1 = vcmask 261120   ;;  %p504_p3 = scmp.ne.s32.totalorder %s734_s3, 0 }
   0x6   :  { %s324_s25 = sld [smem:[#allocation6]] (!%p504_p3) }
   0xa   :  { %s493_s0 = sshll.u32 %s628_s11, 2  ;;  %p121_p2 = scmp.lt.s32.totalorder %s628_s11, 0 }
   0xb   :  { %p102_p0 = scmp.lt.s32.totalorder %s493_s0, 3  ;;  %s491_s13 = sshll.u32 %s90_s12, 2 }
   0xc   :  { %p92_p1 = scmp.lt.s32.totalorder %s491_s13, 3  ;;  %s761_s11 = smov (!%p121_p2, %s628_s11), 0 }
   0xd   :  { %s757_s0 = smov (!%p102_p0, %s493_s0), 3  ;;  %s325_s26 = scvt.s32.f32 (!%p504_p3), %s324_s25 }
   0xe   :  { %s759_s13 = smov (!%p92_p1, %s491_s13), 3  ;;  %s494_s1 = sshll.u32 %s757_s0, 2 }
   0xf   :  { %s105_s15 = scalar_lea.vmem %s736_s5, %s494_s1  ;;  %s492_s16 = sshll.u32 %s759_s13, 2 }
  0x10   :  { %v532_v2 = vld [vmem:[%s105_s15] sm:$0xff]   ;;  %s95_s19 = scalar_lea.vmem %s735_s4, %s492_s16  ;;  %s496_s20 = sshll.u32 %s759_s13, 3  ;;  %v533_v3 = vld [vmem:[%s105_s15 + $0x8] sm:$0xff]  }
  0x11   :  { %s115_s23 = scalar_lea.vmem %s737_s6, %s496_s20  ;;  %520 = vmatprep.subr.msk.bf16.mxu0 %vm741_vm1, %v532_v2  ;;  %v170_v4 = vsel %vm741_vm1, %v532_v2, 0  ;;  %v534_v5 = vld [vmem:[%s95_s19] sm:$0xff]   ;;  %v173_v10 = vsel %vm741_vm1, %v533_v3, 0  ;;  %v535_v11 = vld [vmem:[%s95_s19 + $0x8] sm:$0xff]   ;;  %s123_s6 = scalar_lea.vmem %s738_s7, %s761_s11 }
  0x12   :  { %513 = vmatpush3.bf16.xpose.msra.mxu0 %v170_v4  ;;  %516 = vmatprep.mubr.msk.bf16.mxu0 %vm741_vm1, %v534_v5  ;;  %v226_v6 = vld [vmem:[%s115_s23 + $0x10] sm:$0xff]  ;;  %v224_v7 = vld [vmem:[%s115_s23] sm:$0xff]  ;;  %v227_v8 = vld [vmem:[%s115_s23 + $0x18] sm:$0xff] }
  0x13   :  { %521 = vmatprep.subr.msk.bf16.mxu0 %vm741_vm1, %v533_v3  ;;  %241 = vperm.xlu1 %531, %v226_v6   ;;  %v225_v9 = vld [vmem:[%s115_s23 + $0x8] sm:$0xff]  ;;  %v503_v14 = vld [vmem:[%s123_s6] ss:$0 sm:$0xff] }
  0x14   :  { %231 = vperm.xlu0 %530, %v224_v7  }
  0x17   :  { %246 = vperm.xlu1 %531, %v227_v8  }
  0x18   :  { %236 = vperm.xlu0 %530, %v225_v9  }
  0x1a   :  { %515 = vmatpush3.bf16.xpose.msra.mxu0 %v173_v10 }
  0x21   :  { %517 = vmatmul.mubr.msk.bf16.vlgmr.msra.gmra.mrb[0].mxu0 %vm741_vm1, %v535_v11 }
  0x92   :  { %v242_v12 = vpop.permute.xlu1 %241 }
  0x93   :  { %v232_v13 = vpop.permute.xlu0 %231  ;;  %v257_v15 = vadd.f32 %v503_v14, %v242_v12 }
  0x94   :  { %v255_v21 = vadd.f32 %v503_v14, %v232_v13 }
  0x96   :  { %v247_v16 = vpop.permute.xlu1 %246 }
  0x97   :  { %v237_v18 = vpop.permute.xlu0 %236  ;;  %v258_v24 = vadd.f32 %v503_v14, %v247_v16 }
  0x98   :  { %v256_v28 = vadd.f32 %v503_v14, %v237_v18 }
  0xf4   :  { %v518_v17 = vpop.f32.mrb[0].mxu0 }
  0xf5   :  { %v261_v19 = vmul.f32 2.0, %v518_v17  ;;  %v209_v20 = vpop.f32.mrb[1].mxu0 }
  0xf6   :  { %v259_v22 = vmul.f32 2.0, %v209_v20  ;;  %v519_v23 = vpop.f32.mrb[2].mxu0 }
  0xf7   :  { %v265_v25 = vsub.f32 %v257_v15, %v261_v19  ;;  %v262_v26 = vmul.f32 2.0, %v519_v23  ;;  %v212_v27 = vpop.f32.mrb[3].mxu0 }
  0xf8   :  { %v263_v29 = vsub.f32 %v255_v21, %v259_v22  ;;  %v260_v30 = vmul.f32 2.0, %v212_v27 }
  0xf9   :  { %v269_v31 = vmax.f32 %v265_v25, 0.0  ;;  %v266_v32 = vsub.f32 %v258_v24, %v262_v26 }
  0xfa   :  { %v267_v33 = vmax.f32 %v263_v29, 0.0  ;;  %v264_v34 = vsub.f32 %v256_v28, %v260_v30 }
  0xfb   :  { %v273_v35 = vmul.f32 -0.24999937, %v269_v31  ;;  %v270_v36 = vmax.f32 %v266_v32, 0.0 }
  0xfc   :  { %v271_v37 = vmul.f32 -0.24999937, %v267_v33  ;;  %v268_v38 = vmax.f32 %v264_v34, 0.0  ;;  %v340_v33 = vstv (!%p504_p3), %s325_s26 }
  0xfd   :  { %v279_v39 = vmul.f32 1.442695, %v273_v35  ;;  %v274_v40 = vmul.f32 -0.24999937, %v270_v36  ;;  %v326_v35 = vld [vmem:[#allocation2] sm:$0x1] (!%p504_p3) }
  0xfe   :  { %v275_v41 = vmul.f32 1.442695, %v271_v37  ;;  %v272_v42 = vmul.f32 -0.24999937, %v268_v38 }
  0xff   :  { %536 = vpow2.f32 %v279_v39  ;;  %v281_v43 = vmul.f32 1.442695, %v274_v40 }
 0x100   :  { %538 = vpow2.f32 %v275_v41  ;;  %v277_v44 = vmul.f32 1.442695, %v272_v42 }
 0x101   :  { %540 = vpow2.f32 %v281_v43 }
 0x102   :  { %542 = vpow2.f32 %v277_v44 }
 0x109   :  { %v537_v45 = vpop.eup %536 }
 0x10a   :  { %v539_v46 = vpop.eup %538  ;;  %v285_v47 = vmul.f32 %v537_v45, %v537_v45 }
 0x10b   :  { %v541_v48 = vpop.eup %540  ;;  %v283_v49 = vmul.f32 %v539_v46, %v539_v46 }
 0x10c   :  { %v543_v50 = vpop.eup %542  ;;  %v289_v51 = vmul.f32 %v285_v47, %v285_v47  ;;  %v286_v52 = vmul.f32 %v541_v48, %v541_v48 }
 0x10d   :  { %v287_v53 = vmul.f32 %v283_v49, %v283_v49  ;;  %v284_v54 = vmul.f32 %v543_v50, %v543_v50 }
 0x10e   :  { %v293_v55 = vmul.f32 %v289_v51, %v289_v51  ;;  %v290_v56 = vmul.f32 %v286_v52, %v286_v52  ;;  %v309_v0 = vadd.f32 %v537_v45, %v289_v51 }
 0x10f   :  { %v291_v57 = vmul.f32 %v287_v53, %v287_v53  ;;  %v288_v58 = vmul.f32 %v284_v54, %v284_v54  ;;  %v307_v3 = vadd.f32 %v539_v46, %v287_v53 }
 0x110   :  { %v297_v59 = vmul.f32 %v293_v55, %v293_v55  ;;  %v294_v60 = vmul.f32 %v290_v56, %v290_v56  ;;  %v310_v8 = vadd.f32 %v541_v48, %v290_v56 }
 0x111   :  { %v295_v61 = vmul.f32 %v291_v57, %v291_v57  ;;  %v292_v62 = vmul.f32 %v288_v58, %v288_v58  ;;  %v308_v12 = vadd.f32 %v543_v50, %v288_v58 }
 0x112   :  { %v301_v63 = vmul.f32 %v297_v59, %v297_v59  ;;  %v298_v1 = vmul.f32 %v294_v60, %v294_v60  ;;  %v313_v6 = vadd.f32 %v309_v0, %v297_v59 }
 0x113   :  { %v299_v2 = vmul.f32 %v295_v61, %v295_v61  ;;  %v296_v4 = vmul.f32 %v292_v62, %v292_v62  ;;  %v311_v10 = vadd.f32 %v307_v3, %v295_v61  ;;  %323 = sbr.rel (%p504_p3) target bundleno = 307 (0x133), region = 25 }
 0x114   :  { %v305_v5 = vmul.f32 %v301_v63, %v301_v63  ;;  %v302_v7 = vmul.f32 %v298_v1, %v298_v1  ;;  %v314_v15 = vadd.f32 %v310_v8, %v298_v1 }
 0x115   :  { %v303_v9 = vmul.f32 %v299_v2, %v299_v2  ;;  %v300_v11 = vmul.f32 %v296_v4, %v296_v4  ;;  %v312_v18 = vadd.f32 %v308_v12, %v296_v4 }
 0x116   :  { %v652_v13 = vadd.f32 %v313_v6, %v305_v5  ;;  %v306_v14 = vmul.f32 %v302_v7, %v302_v7 }
 0x117   :  { %v654_v16 = vadd.f32 %v311_v10, %v303_v9  ;;  %v304_v17 = vmul.f32 %v300_v11, %v300_v11 }
 0x118   :  { %v656_v19 = vadd.f32 %v314_v15, %v306_v14  ;;  %v330_v24 = vsel (!%p504_p3), %vm741_vm1, %v652_v13, 0.0 }
 0x119   :  { %v658_v20 = vadd.f32 %v312_v18, %v304_v17  ;;  %v327_v21 = vsel (!%p504_p3), %vm741_vm1, %v654_v16, 0.0 }
 0x11a   :  { %v332_v25 = vsel %vm741_vm1, %v656_v19, 0.0 }
 0x11b   :  { %v328_v22 = vsel %vm741_vm1, %v658_v20, 0.0 }
 0x11c   :  { %v329_v23 = vadd.f32 %v328_v22, %v327_v21 }
 0x11e   :  { %v331_v26 = vadd.f32 %v330_v24, %v329_v23 }
 0x120   :  { %v333_v27 = vadd.f32 %v332_v25, %v331_v26 }
 0x122   :  { %v334_v28 = vrot.slane %v333_v27, 4 }
 0x124   :  { %v335_v29 = vadd.f32 %v334_v28, %v333_v27 }
 0x126   :  { %v336_v30 = vrot.slane %v335_v29, 2 }
 0x128   :  { %v337_v31 = vadd.f32 %v336_v30, %v335_v29 }
 0x12a   :  { %v338_v32 = vrot.slane %v337_v31, 1 }
 0x12c   :  { %v339_v34 = vadd.f32 %v338_v32, %v337_v31 }
 0x12e   :  { %v341_v36 = vmul.f32 %v340_v33, %v339_v34 }
 0x130   :  { %v342_v37 = vadd.f32 %v341_v36, %v326_v35 }
 0x132   :  { %344 = vst.msk [vmem:[#allocation2] sm:$0x1] %vm740_vm0, %v342_v37 }
 0x133 PF:  { %p505_p4 = scmp.eq.s32.totalorder %s734_s3, 0 }
 0x134   :  { %s349_s29 = sld [smem:[#allocation4]] (!%p505_p4)  ;;  %v353_v38 = vlaneseq (!%p505_p4)  ;;  %v570_v53 = vmov (!%p505_p4), 0.0   ;;  %vm571_vm1 = vmmov (!%p505_p4), 1   ;;  %v572_v62 = vmov (!%p505_p4), -1.0  }
 0x135   :  { %348 = sbr.rel (%p505_p4) target bundleno = 355 (0x163), region = 29  ;;  %s351_s30 = sld [smem:[#allocation5]] (!%p505_p4) }
 0x136   :  { %v354_v39 = vshrl.u32 (!%p505_p4), %v353_v38, 7  ;;  %v364_v43 = vand.u32 (!%p505_p4), 127, %v353_v38 }
 0x138   :  { %v355_v40 = vadd.s32 (!%p505_p4), 8, %v354_v39  ;;  %v356_v41 = vadd.s32 (!%p505_p4), 16, %v354_v39  ;;  %v357_v42 = vadd.s32 (!%p505_p4), 24, %v354_v39 }
 0x139   :  { %v417_v31 = vld [vmem:[#allocation2] sm:$0x1] (!%p505_p4) }
 0x13a   :  { %s506_s9 = sshll.u32 (!%p505_p4), %s349_s29, 5 }
 0x13b   :  { %s507_s10 = sshll.u32 (!%p505_p4), %s351_s30, 5  ;;  %v358_v44 = vstv (!%p505_p4), %s506_s9 }
 0x13c   :  { %v365_v45 = vstv %s507_s10  ;;  %v359_v46 = vadd.s32 %v358_v44, %v354_v39  ;;  %v360_v47 = vadd.s32 %v358_v44, %v355_v40  ;;  %v361_v48 = vadd.s32 %v358_v44, %v356_v41 }
 0x13d   :  { %v362_v49 = vadd.s32 %v358_v44, %v357_v42  ;;  %v366_v50 = vadd.s32 %v365_v45, %v364_v43 }
 0x13e   :  { %vm367_vm2 = vcmp.lt.s32.totalorder %v359_v46, 16  ;;  %vm368_vm3 = vcmp.lt.s32.totalorder %v360_v47, 16  ;;  %vm369_vm4 = vcmp.lt.s32.totalorder %v361_v48, 16 }
 0x13f   :  { %vm370_vm5 = vcmp.lt.s32.totalorder %v362_v49, 16  ;;  %vm371_vm6 = vcmp.lt.s32.totalorder %v366_v50, 16  ;;  %vm384_vm8 = vcmp.gt.s32.totalorder %v366_v50, %v359_v46  ;;  %vm388_vm9 = vcmp.eq.s32.totalorder %v366_v50, %v359_v46 }
 0x140   :  { %vm676_vm7 = vmxor %vm367_vm2, %vm371_vm6  ;;  %vm389_vm10 = vcmp.eq.s32.totalorder %v366_v50, %v360_v47  ;;  %vm390_vm11 = vcmp.eq.s32.totalorder %v366_v50, %v361_v48  ;;  %vm385_vm13 = vcmp.gt.s32.totalorder %v366_v50, %v360_v47  ;;  %vm391_vm14 = vcmp.eq.s32.totalorder %v366_v50, %v362_v49 }
 0x141   :  { %vm681_vm12 = vmxor %vm368_vm3, %vm371_vm6  ;;  %v392_v54 = vsel %vm388_vm9, 1.0, %v570_v53  ;;  %v393_v55 = vsel %vm389_vm10, 1.0, %v570_v53  ;;  %vm386_vm2 = vcmp.gt.s32.totalorder %v366_v50, %v361_v48  ;;  %v394_v57 = vsel %vm390_vm11, 1.0, %v570_v53 }
 0x142   :  { %vm686_vm15 = vmxor %vm369_vm4, %vm371_vm6  ;;  %vm387_vm3 = vcmp.gt.s32.totalorder %v366_v50, %v362_v49  ;;  %v395_v59 = vsel %vm391_vm14, 1.0, %v570_v53  ;;  %v396_v60 = vsel %vm384_vm8, 2.0, %v392_v54  ;;  %v397_v61 = vsel %vm385_vm13, 2.0, %v393_v55 }
 0x143   :  { %vm692_vm0 = vmxor %vm370_vm5, %vm371_vm6  ;;  %v398_v0 = vsel %vm386_vm2, 2.0, %v394_v57  ;;  %vm400_vm10 = vcmp.lt.s32.totalorder %v359_v46, 32  ;;  %vm404_vm5 = vcmp.lt.s32.totalorder %v366_v50, 32  ;;  %v399_v2 = vsel %vm387_vm3, 2.0, %v395_v59 }
 0x144   :  { %vm376_vm9 = vmxor %vm676_vm7, %vm571_vm1  ;;  %vm401_vm11 = vcmp.lt.s32.totalorder %v360_v47, 32  ;;  %vm402_vm7 = vcmp.lt.s32.totalorder %v361_v48, 32 }
 0x145   :  { %vm377_vm4 = vmxor %vm681_vm12, %vm571_vm1  ;;  %v380_v63 = vsel %vm376_vm9, 1.0, %v572_v62  ;;  %vm403_vm12 = vcmp.lt.s32.totalorder %v362_v49, 32 }
 0x146   :  { %vm378_vm6 = vmxor %vm686_vm15, %vm571_vm1  ;;  %v381_v1 = vsel %vm377_vm4, 1.0, %v572_v62  ;;  %v409_v3 = vmul.f32 %v396_v60, %v380_v63  ;;  %vm754_vm4 = vcmask 253952  }
 0x147   :  { %vm379_vm8 = vmxor %vm692_vm0, %vm571_vm1  ;;  %v382_v4 = vsel %vm378_vm6, 1.0, %v572_v62  ;;  %v410_v5 = vmul.f32 %v397_v61, %v381_v1  ;;  %vm750_vm0 = vcmask 261120  }
 0x148   :  { %v383_v6 = vsel %vm379_vm8, 1.0, %v572_v62  ;;  %vm405_vm13 = vmand %vm400_vm10, %vm404_vm5  ;;  %v411_v7 = vmul.f32 %v398_v0, %v382_v4 }
 0x149   :  { %vm406_vm14 = vmand %vm401_vm11, %vm404_vm5  ;;  %v412_v8 = vmul.f32 %v399_v2, %v383_v6  ;;  %v413_v9 = vsel %vm405_vm13, %v409_v3, 0.0 }
 0x14a   :  { %vm407_vm15 = vmand %vm402_vm7, %vm404_vm5  ;;  %v414_v10 = vsel %vm406_vm14, %v410_v5, 0.0  ;;  %v418_v11 = vmul.f32 %v413_v9, %v654_v16 }
 0x14b   :  { %vm408_vm2 = vmand %vm403_vm12, %vm404_vm5  ;;  %v415_v12 = vsel %vm407_vm15, %v411_v7, 0.0  ;;  %v419_v14 = vmul.f32 %v414_v10, %v658_v20 }
 0x14c   :  { %v416_v15 = vsel %vm408_vm2, %v412_v8, 0.0  ;;  %v420_v17 = vmul.f32 %v415_v12, %v652_v13  ;;  %v422_v18 = vsel %vm750_vm0, %v418_v11, 0.0  ;;  %vm751_vm1 = vmmov %vm750_vm0 }
 0x14d   :  { %v421_v21 = vmul.f32 %v416_v15, %v656_v19  ;;  %v423_v22 = vsel %vm751_vm1, %v419_v14, 0.0  ;;  %vm752_vm3 = vmmov %vm750_vm0 }
 0x14e   :  { %v424_v23 = vadd.f32 %v423_v22, %v422_v18  ;;  %v425_v24 = vsel %vm752_vm3, %v420_v17, 0.0  ;;  %vm753_vm9 = vmmov %vm750_vm0 }
 0x14f   :  { %v427_v25 = vsel %vm753_vm9, %v421_v21, 0.0 }
 0x150   :  { %v426_v16 = vadd.f32 %v425_v24, %v424_v23 }
 0x152   :  { %v428_v26 = vadd.f32 %v427_v25, %v426_v16 }
 0x154   :  { %v429_v27 = vrot.slane %v428_v26, 4 }
 0x156   :  { %v430_v28 = vadd.f32 %v429_v27, %v428_v26 }
 0x158   :  { %v431_v29 = vrot.slane %v430_v28, 2 }
 0x15a   :  { %v432_v20 = vadd.f32 %v431_v29, %v430_v28 }
 0x15c   :  { %v433_v30 = vrot.slane %v432_v20, 1 }
 0x15e   :  { %v434_v13 = vadd.f32 %v433_v30, %v432_v20 }
 0x160   :  { %v435_v32 = vadd.f32 %v434_v13, %v417_v31 }
 0x162   :  { %437 = vst.msk [vmem:[#allocation2] sm:$0x1] %vm754_vm4, %v435_v32 }
 0x163 PF:  { %vm755_vm10 = vcmask 253952   ;;  %s573_s3 = smov [#allocation8]   ;;  %vm454_vm5 = vcmask 0  }
 0x164   :  { %s462_s11 = sshll.u32 %s573_s3, 4  ;;  %s463_s11 = int_to_ptr.vmem [resolvable:$true] %s462_s11 }
 0x165   :  { %s544_s0 = scalar_lea.vmem %s463_s11, 16  ;;  %s548_s13 = scalar_lea.vmem %s463_s11, 32 }
 0x166   :  { %p545_p5 = scmp.ne.s32.totalorder %s463_s11, %s544_s0  ;;  %p549_p6 = scmp.lt.s32.totalorder %s463_s11, %s463_s11 }
 0x167   :  { %p550_p7 = scmp.lt.s32.totalorder %s548_s13, %s544_s0 }
 0x169   :  { %v441_v19 = vld [vmem:[#allocation2] sm:$0x1]  ;;  %p551_p8 = por %p550_p7, %p549_p6 }
 0x16a   :  { %v443_v33 = vsel %vm755_vm10, %v441_v19, 0.0 }
 0x16b   :  { %444 = vadd.xlane.f32.xlu0 %v443_v33  ;;  %p552_p9 = pnand %p551_p8, %p545_p5 }
 0x1f8   :  { %v445_v34 = vpop.xlane.xlu0 %444 }
 0x1f9   :  { %v446_v35 = vrot.slane %v445_v34, 4 }
 0x1fb   :  { %v447_v36 = vadd.f32 %v446_v35, %v445_v34 }
 0x1fd   :  { %v448_v37 = vrot.slane %v447_v36, 2 }
 0x1ff   :  { %v449_v38 = vadd.f32 %v448_v37, %v447_v36 }
 0x201   :  { %v450_v39 = vrot.slane %v449_v38, 1 }
 0x203   :  { %v451_v40 = vadd.f32 %v450_v39, %v449_v38 }
 0x205   :  { %522 = vpush %v451_v40 }
 0x236   :  { %s523_s12 = spop %522 }
 0x237   :  { %v453_v41 = vstv %s523_s12 }
 0x238   :  { %455 = vst.msk [vmem:[#allocation8] sm:$0x1] %vm454_vm5, %v453_v41 }
 0x239   :  { %555 = shalt.err (!%p552_p9)
}
 0x23a   :  { %s556_s14 = scalar_lea.hbm %s739_s8, 16 }
 0x23b   :  { %p557_p10 = scmp.ne.s32.totalorder %s739_s8, %s556_s14  ;;  %p560_p11 = scmp.lt.u32.totalorder %s556_s14, %s739_s8 }
 0x23d   :  { %p562_p12 = pnand %p560_p11, %p557_p10 }
 0x23f   :  { %565 = shalt.err (!%p562_p12)
}
 0x240   :  { %465 = dma.vmem_to_hbm [thread:$0]  %s463_s11, 16, %s739_s8, [#allocation9]  }
 0x241   :  { %566 = dma.done.wait [#allocation9], 16  }
 0x242   :  { %567 = vsyncadd [#allocation9], 4294967280 }
 0x243   :  { %469 = vsyncpa [#allocation9], 1 }

</bundles_post_ra>
